<compile_context>
chip_gen: v7x
topology: tpu7x:2x2x1
jax: 0.10.0
libtpu: 0.0.40
codegen_flags: <defaults>
</compile_context>

<pallas_src>
import functools
import math

import jax
import jax.numpy as jnp
from jax.experimental import pallas as pl
from jax.experimental.pallas import tpu as pltpu


def _fused_mlp_kernel(*refs, num_layers: int):
    """refs = (x_ref, w0, b0, w1, b1, ..., w_last, b_last_smem, out_ref).

    Hidden biases b_i are (1, N) VMEM tiles; the last bias is a (1,) SMEM
    scalar.  All intermediate activations live in vregs only.
    """
    x_ref = refs[0]
    out_ref = refs[-1]
    p = refs[1:-1]

    h = x_ref[...]
    for i in range(num_layers):
        w = p[2 * i][...]
        h = jnp.dot(h, w, preferred_element_type=jnp.float32)
        if i < num_layers - 1:
            h = h + p[2 * i + 1][...]       # (1, N) broadcast over batch tile
            h = jnp.maximum(h, 0.0)
        else:
            h = h + p[2 * i + 1][0]         # scalar bias from SMEM
    out_ref[...] = h.astype(out_ref.dtype)


def binary_classifier_forward(x, params, *, tb=None):
    """Fused forward pass.  x: (B, D); params: list of (W:(din,dout), b:(dout,))."""
    B, D = x.shape
    num_layers = len(params)
    assert num_layers >= 1 and params[-1][0].shape[1] == 1

    # Batch tile: whole batch if small, else 256 rows (multiple of 8).
    if tb is None:
        tb = B if B <= 256 else 256
    grid = (pl.cdiv(B, tb),)

    in_specs = [pl.BlockSpec((tb, D), lambda i: (i, 0))]
    call_args = [x]
    for li, (w, b) in enumerate(params):
        din, dout = w.shape
        # Weights: whole-array block, constant index_map -> resident across
        # all batch tiles (no re-fetch per grid step beyond pipelining).
        in_specs.append(pl.BlockSpec((din, dout), lambda i: (0, 0)))
        call_args.append(w)
        if li < num_layers - 1:
            in_specs.append(pl.BlockSpec((1, dout), lambda i: (0, 0)))
            call_args.append(b.reshape(1, dout))
        else:
            # Final scalar bias: SMEM, read as a scalar inside the kernel.
            in_specs.append(pl.BlockSpec(memory_space=pltpu.MemorySpace.SMEM))
            call_args.append(b)  # shape (1,)

    kernel = functools.partial(_fused_mlp_kernel, num_layers=num_layers)
    return pl.pallas_call(
        kernel,
        out_shape=jax.ShapeDtypeStruct((B, 1), x.dtype),
        grid=grid,
        in_specs=in_specs,
        out_specs=pl.BlockSpec((tb, 1), lambda i: (i, 0)),
        compiler_params=pltpu.CompilerParams(
            dimension_semantics=("parallel",),   # batch tiles independent (v7x megacore)
        ),
    )(*call_args)


def init_params(key, input_size, layer_sizes):
    """Deterministic init matching torch.nn.Linear's U(-1/sqrt(fan_in), ...)."""
    sizes = list(layer_sizes) + [1]
    params = []
    prev = input_size
    for out in sizes:
        key, kw, kb = jax.random.split(key, 3)
        bound = 1.0 / math.sqrt(prev)
        w = jax.random.uniform(kw, (prev, out), jnp.float32, -bound, bound)
        b = jax.random.uniform(kb, (out,), jnp.float32, -bound, bound)
        params.append((w, b))
        prev = out
    return params


if __name__ == "__main__":
    key = jax.random.PRNGKey(0)
    key, kx = jax.random.split(key)

    batch = 8
    input_size = 32
    layer_sizes = [64, 32]

    x = jax.random.normal(kx, (batch, input_size), jnp.float32)
    params = init_params(key, input_size, layer_sizes)

    out = binary_classifier_forward(x, params)
    out = jax.block_until_ready(out)
    assert out.shape == (batch, 1), out.shape

    # Pure-JAX reference check (same params / same math).
    ref = x
    for i, (w, b) in enumerate(params):
        ref = ref @ w + b
        if i < len(params) - 1:
            ref = jnp.maximum(ref, 0.0)
    assert jnp.allclose(out, ref, atol=1e-5, rtol=1e-5), (
        float(jnp.max(jnp.abs(out - ref)))
    )

    print("KERNEL_OK")
</pallas_src>

<mosaic_0001>
module attributes {stable_mosaic.version = 11 : i64} {
  func.func @_fused_mlp_kernel(%arg0: i32, %arg1: memref<8x32xf32, #tpu.memory_space<vmem>>, %arg2: memref<32x64xf32, #tpu.memory_space<vmem>>, %arg3: memref<1x64xf32, #tpu.memory_space<vmem>>, %arg4: memref<64x32xf32, #tpu.memory_space<vmem>>, %arg5: memref<1x32xf32, #tpu.memory_space<vmem>>, %arg6: memref<32x1xf32, #tpu.memory_space<vmem>>, %arg7: memref<1xf32, #tpu.memory_space<smem>>, %arg8: memref<8x1xf32, #tpu.memory_space<vmem>>) attributes {dimension_semantics = [#tpu.dimension_semantics<parallel>], iteration_bounds = array<i64: 1>, scalar_prefetch = 0 : i64, scratch_operands = 0 : i64, tpu.core_type = #tpu.core_type<tc>, window_params = [{transform_indices = @transform_0, window_bounds = array<i64: 8, 32>}, {pipeline_mode = #tpu.pipeline_mode<synchronous>, transform_indices = @transform_1, window_bounds = array<i64: 32, 64>}, {pipeline_mode = #tpu.pipeline_mode<synchronous>, transform_indices = @transform_2, window_bounds = array<i64: 1, 64>}, {pipeline_mode = #tpu.pipeline_mode<synchronous>, transform_indices = @transform_3, window_bounds = array<i64: 64, 32>}, {pipeline_mode = #tpu.pipeline_mode<synchronous>, transform_indices = @transform_4, window_bounds = array<i64: 1, 32>}, {pipeline_mode = #tpu.pipeline_mode<synchronous>, transform_indices = @transform_5, window_bounds = array<i64: 32, 1>}, {transform_indices = @transform_6, window_bounds = array<i64: 1>}, {transform_indices = @transform_7, window_bounds = array<i64: 8, 1>}]} {
    %c0 = arith.constant 0 : index
    %c0_0 = arith.constant 0 : index
    %0 = vector.load %arg1[%c0, %c0_0] : memref<8x32xf32, #tpu.memory_space<vmem>>, vector<8x32xf32>
    %c0_1 = arith.constant 0 : index
    %c0_2 = arith.constant 0 : index
    %1 = vector.load %arg2[%c0_1, %c0_2] : memref<32x64xf32, #tpu.memory_space<vmem>>, vector<32x64xf32>
    %cst = arith.constant dense<0.000000e+00> : vector<8x64xf32>
    %2 = tpu.matmul %0, %1, %cst {dimension_numbers = #tpu.dot_dimension_numbers<[1], [0], [0], [1], [0, 0, 1, 1], [], []>} : vector<8x32xf32>, vector<32x64xf32>, vector<8x64xf32> -> vector<8x64xf32>
    %c0_3 = arith.constant 0 : index
    %c0_4 = arith.constant 0 : index
    %3 = vector.load %arg3[%c0_3, %c0_4] : memref<1x64xf32, #tpu.memory_space<vmem>>, vector<1x64xf32>
    %4 = vector.broadcast %3 : vector<1x64xf32> to vector<8x64xf32>
    %5 = arith.addf %2, %4 : vector<8x64xf32>
    %cst_5 = arith.constant 0.000000e+00 : f32
    %6 = vector.broadcast %cst_5 : f32 to vector<8x64xf32>
    %7 = arith.maximumf %5, %6 : vector<8x64xf32>
    %c0_6 = arith.constant 0 : index
    %c0_7 = arith.constant 0 : index
    %8 = vector.load %arg4[%c0_6, %c0_7] : memref<64x32xf32, #tpu.memory_space<vmem>>, vector<64x32xf32>
    %cst_8 = arith.constant dense<0.000000e+00> : vector<8x32xf32>
    %9 = tpu.matmul %7, %8, %cst_8 {dimension_numbers = #tpu.dot_dimension_numbers<[1], [0], [0], [1], [0, 0, 1, 1], [], []>} : vector<8x64xf32>, vector<64x32xf32>, vector<8x32xf32> -> vector<8x32xf32>
    %c0_9 = arith.constant 0 : index
    %c0_10 = arith.constant 0 : index
    %10 = vector.load %arg5[%c0_9, %c0_10] : memref<1x32xf32, #tpu.memory_space<vmem>>, vector<1x32xf32>
    %11 = vector.broadcast %10 : vector<1x32xf32> to vector<8x32xf32>
    %12 = arith.addf %9, %11 : vector<8x32xf32>
    %cst_11 = arith.constant 0.000000e+00 : f32
    %13 = vector.broadcast %cst_11 : f32 to vector<8x32xf32>
    %14 = arith.maximumf %12, %13 : vector<8x32xf32>
    %c0_12 = arith.constant 0 : index
    %c0_13 = arith.constant 0 : index
    %15 = vector.load %arg6[%c0_12, %c0_13] : memref<32x1xf32, #tpu.memory_space<vmem>>, vector<32x1xf32>
    %cst_14 = arith.constant dense<0.000000e+00> : vector<8x1xf32>
    %16 = tpu.matmul %14, %15, %cst_14 {dimension_numbers = #tpu.dot_dimension_numbers<[1], [0], [0], [1], [0, 0, 1, 1], [], []>} : vector<8x32xf32>, vector<32x1xf32>, vector<8x1xf32> -> vector<8x1xf32>
    %c0_15 = arith.constant 0 : index
    %17 = memref.load %arg7[%c0_15] : memref<1xf32, #tpu.memory_space<smem>>
    %18 = vector.broadcast %17 : f32 to vector<8x1xf32>
    %19 = arith.addf %16, %18 : vector<8x1xf32>
    %c0_16 = arith.constant 0 : index
    %c0_17 = arith.constant 0 : index
    %20 = vector.load %arg8[%c0_16, %c0_17] : memref<8x1xf32, #tpu.memory_space<vmem>>, vector<8x1xf32>
    tpu.vector_store %arg8[%c0_16, %c0_17], %19 {strides = array<i32>} : memref<8x1xf32, #tpu.memory_space<vmem>>, vector<8x1xf32>,
    return
  }
  func.func @transform_0(%arg0: i32) -> (i32, i32) {
    %c0_i32 = arith.constant 0 : i32
    %c0_i32_0 = arith.constant 0 : i32
    return %arg0, %c0_i32 : i32, i32
  }
  func.func @transform_1(%arg0: i32) -> (i32, i32) {
    %c0_i32 = arith.constant 0 : i32
    %c0_i32_0 = arith.constant 0 : i32
    %c0_i32_1 = arith.constant 0 : i32
    return %c0_i32, %c0_i32_0 : i32, i32
  }
  func.func @transform_2(%arg0: i32) -> (i32, i32) {
    %c0_i32 = arith.constant 0 : i32
    %c0_i32_0 = arith.constant 0 : i32
    %c0_i32_1 = arith.constant 0 : i32
    return %c0_i32, %c0_i32_0 : i32, i32
  }
  func.func @transform_3(%arg0: i32) -> (i32, i32) {
    %c0_i32 = arith.constant 0 : i32
    %c0_i32_0 = arith.constant 0 : i32
    %c0_i32_1 = arith.constant 0 : i32
    return %c0_i32, %c0_i32_0 : i32, i32
  }
  func.func @transform_4(%arg0: i32) -> (i32, i32) {
    %c0_i32 = arith.constant 0 : i32
    %c0_i32_0 = arith.constant 0 : i32
    %c0_i32_1 = arith.constant 0 : i32
    return %c0_i32, %c0_i32_0 : i32, i32
  }
  func.func @transform_5(%arg0: i32) -> (i32, i32) {
    %c0_i32 = arith.constant 0 : i32
    %c0_i32_0 = arith.constant 0 : i32
    %c0_i32_1 = arith.constant 0 : i32
    return %c0_i32, %c0_i32_0 : i32, i32
  }
  func.func @transform_6(%arg0: i32) -> i32 {
    %c0_i32 = arith.constant 0 : i32
    %c0_i32_0 = arith.constant 0 : i32
    return %c0_i32 : i32
  }
  func.func @transform_7(%arg0: i32) -> (i32, i32) {
    %c0_i32 = arith.constant 0 : i32
    %c0_i32_0 = arith.constant 0 : i32
    return %arg0, %c0_i32 : i32, i32
  }
}

</mosaic_0001>

<bundles_post_ra>
// kernel: tpu_custom_call.1
= control target key start
LH: loop header
LB: loop body
LE: loop exit
PB: predicated region body
PF: predicated region fallthrough
CT: control target
= control target key end

     0   :  { %v381_v0 = vmov 0.0|0.0   ;;  %vm382_vm0 = vmmov 0   ;;  %v383_v4 = vmov 0.0   ;;  %vm39_vm1 = vcmask 261120   ;;  %s492_s1 = inlined_call_operand.vmem [shape: f32[32,64], index: 1, kind: input, shape index: {}]   ;;  %s493_s3 = inlined_call_operand.vmem [shape: f32[64,32], index: 3, kind: input, shape index: {}]   ;;  %s494_s0 = inlined_call_operand.vmem [shape: f32[8,32], index: 0, kind: input, shape index: {}]   ;;  %s495_s5 = inlined_call_operand.vmem [shape: f32[32,1], index: 5, kind: input, shape index: {}]   ;;  %s496_s2 = inlined_call_operand.vmem [shape: f32[1,64], index: 2, kind: input, shape index: {}]   ;;  %s497_s4 = inlined_call_operand.vmem [shape: f32[1,32], index: 4, kind: input, shape index: {}]   ;;  %s498_s6 = inlined_call_operand.<no memory space> [shape: f32[1], index: 6, kind: input, shape index: {}]   ;;  %s499_s7 = inlined_call_operand.vmem [shape: f32[8,1], index: 7, kind: output, shape index: {}]  }
   0x1   :  { %354 = vmatprep.subr.bf16.mxu0 %v381_v0  ;;  %v28_v1 = vld [vmem:[%s492_s1] sm:$0xff]  ;;  %v29_v2 = vld [vmem:[%s492_s1 + $0x8] sm:$0xff]  ;;  %v30_v3 = vld [vmem:[%s492_s1 + $0x10] sm:$0xff]  ;;  %321 = vmatprep.mubr.msk.f32.mxu0 %vm382_vm0, %v383_v4  ;;  %vm129_vm2 = vcmask 523264   ;;  %v209_v37 = vstv %s498_s6  ;;  %vm283_vm3 = vcmask 7168  }
   0x2   :  { %v355_v5 = vpack.c.bf16 %v29_v2, %v28_v1  ;;  %v31_v6 = vld [vmem:[%s492_s1 + $0x18] sm:$0xff]  ;;  %360 = vmatprep.subr.bf16.mxu1 %v381_v0  ;;  %v114_v7 = vld [vmem:[%s493_s3] sm:$0xff]  ;;  %340 = vmatprep.mubr.msk.f32.mxu1 %vm382_vm0, %v383_v4  ;;  %v115_v8 = vld [vmem:[%s493_s3 + $0x8] sm:$0xff] }
   0x3   :  { %v116_v9 = vld [vmem:[%s493_s3 + $0x10] sm:$0xff]  ;;  %v117_v10 = vld [vmem:[%s493_s3 + $0x18] sm:$0xff]  ;;  %v358_v11 = vpack.c.bf16 %v31_v6, %v30_v3  ;;  %v361_v12 = vpack.c.bf16 %v115_v8, %v114_v7  ;;  %v118_v14 = vld [vmem:[%s493_s3 + $0x20] sm:$0xff] }
   0x4   :  { %356 = vmatpush3.bf16.msra.mxu0 %v355_v5  ;;  %v364_v13 = vpack.c.bf16 %v117_v10, %v116_v9  ;;  %v119_v15 = vld [vmem:[%s493_s3 + $0x28] sm:$0xff]  ;;  %v27_v16 = vld [vmem:[%s494_s0] sm:$0xff]  ;;  %v120_v18 = vld [vmem:[%s493_s3 + $0x30] sm:$0xff] }
   0x5   :  { %357 = vmatprep.subr.bf16.mxu0 %v381_v0  ;;  %362 = vmatpush3.bf16.msra.mxu1 %v361_v12  ;;  %v367_v17 = vpack.c.bf16 %v119_v15, %v118_v14  ;;  %v121_v19 = vld [vmem:[%s493_s3 + $0x38] sm:$0xff]  ;;  %v204_v21 = vld [vmem:[%s495_s5] sm:$0xff]  ;;  %v205_v22 = vld [vmem:[%s495_s5 + $0x8] sm:$0xff] }
   0x6   :  { %363 = vmatprep.subr.bf16.mxu1 %v381_v0  ;;  %v370_v20 = vpack.c.bf16 %v121_v19, %v120_v18  ;;  %v373_v23 = vpack.c.bf16 %v205_v22, %v204_v21  ;;  %v289_v24 = vld [vmem:[%s496_s2] ss:$0 sm:$0xff]  ;;  %v206_v29 = vld [vmem:[%s495_s5 + $0x10] sm:$0xff]  ;;  %v207_v30 = vld [vmem:[%s495_s5 + $0x18] sm:$0xff] }
   0x7   :  { %v376_v31 = vpack.c.bf16 %v207_v30, %v206_v29  ;;  %v291_v32 = vld [vmem:[%s497_s4] ss:$0 sm:$0xff] }
   0x8   :  { %359 = vmatpush3.bf16.msra.mxu0 %v358_v11 }
   0x9   :  { %372 = vmatprep.subr.bf16.mxu0 %v381_v0  ;;  %365 = vmatpush3.bf16.msra.mxu1 %v364_v13 }
   0xa   :  { %366 = vmatprep.subr.bf16.mxu1 %v381_v0 }
   0xb   :  { %322 = vmatmul.mubr.msk.f32.vlgmr.msra.gmra.mrb[0].mxu0 %vm39_vm1, %v27_v16 }
   0xc   :  { %351 = vmatprep.mubr.msk.f32.mxu0 %vm382_vm0, %v383_v4  ;;  %374 = vmatpush3.bf16.msra.mxu0 %v373_v23 }
   0xd   :  { %368 = vmatpush3.bf16.msra.mxu1 %v367_v17  ;;  %375 = vmatprep.subr.bf16.mxu0 %v381_v0 }
   0xe   :  { %369 = vmatprep.subr.bf16.mxu1 %v381_v0 }
  0x10   :  { %377 = vmatpush3.bf16.msra.mxu0 %v376_v31 }
  0x11   :  { %371 = vmatpush3.bf16.msra.mxu1 %v370_v20 }
  0xde   :  { %v109_v25 = vpop.f32.mrb[0].mxu0 }
  0xdf   :  { %v110_v26 = vadd.f32 %v289_v24, %v109_v25  ;;  %v323_v27 = vpop.f32.mrb[1].mxu0 }
  0xe1   :  { %v113_v28 = vmax.f32 %v110_v26, 0.0 }
  0xe3   :  { %341 = vmatmul.mubr.msk.f32.vlgmr.msra.gmra.mrb[0].mxu1 %vm129_vm2, %v113_v28 }
 0x1b6   :  { %v199_v33 = vpop.f32.mrb[0].mxu1 }
 0x1b7   :  { %v200_v34 = vadd.f32 %v291_v32, %v199_v33  ;;  %v342_v35 = vpop.f32.mrb[1].mxu1 }
 0x1b9   :  { %v203_v36 = vmax.f32 %v200_v34, 0.0 }
 0x1bb   :  { %352 = vmatmul.mubr.msk.f32.vlgmr.msra.gmra.mrb[2].mxu0 %vm39_vm1, %v203_v36 }
 0x28e   :  { %v279_v38 = vpop.f32.mrb[2].mxu0 }
 0x28f   :  { %v280_v39 = vadd.f32 %v279_v38, %v209_v37  ;;  %v353_v40 = vpop.f32.mrb[3].mxu0 }
 0x291   :  { %284 = vst.msk [vmem:[%s499_s7] sm:$0xff] %vm283_vm3, %v280_v39 }

</bundles_post_ra>
